<compile_context>
chip_gen: v7x
topology: tpu7x:2x2x1
jax: 0.10.0
libtpu: 0.0.40
codegen_flags: <defaults>
</compile_context>

<pallas_src>
import functools

import jax
import jax.numpy as jnp
from jax.experimental import pallas as pl
from jax.experimental.pallas import tpu as pltpu


def _round_up(n, m):
    return ((n + m - 1) // m) * m


# ----------------------------- Pallas kernel -------------------------------


def _gfn_mlp_kernel(x_ref, w_in_ref, b_in_ref, w_h_ref, b_h_ref,
                    w_out_ref, b_out_ref, o_ref, *, num_layers):
    # Input projection: bf16 x bf16 -> f32 accumulate on the MXU.
    h = jnp.dot(x_ref[...], w_in_ref[...],
                preferred_element_type=jnp.float32) + b_in_ref[...]

    # Hidden stack: Dropout (identity in eval) -> ReLU -> Linear, repeated.
    # ReLU / bias adds stay f32; cast to bf16 only right at the MXU input.
    # TODO(synk): training-mode Dropout (stochastic masking) is not applied;
    #             eval-mode semantics (identity) are implemented instead.
    for l in range(num_layers):
        a = jnp.maximum(h, 0.0).astype(jnp.bfloat16)
        h = jnp.dot(a, w_h_ref[l],
                    preferred_element_type=jnp.float32) + b_h_ref[l]

    # Output projection (no ReLU before it, matching nn.Sequential ordering).
    out = jnp.dot(h.astype(jnp.bfloat16), w_out_ref[...],
                  preferred_element_type=jnp.float32) + b_out_ref[...]
    o_ref[...] = out.astype(o_ref.dtype)


# ------------------------------ Wrapper -------------------------------------


def gfn_mlp_forward(x, params, *, batch_tile=256):
    """Forward pass of GFNMLP (non-return_all path; `mask` unused there)."""
    w_in, b_in, w_h, b_h, w_out, b_out = (
        params["w_in"], params["b_in"], params["w_h"],
        params["b_h"], params["w_out"], params["b_out"],
    )
    B, d_in = x.shape
    L, H, _ = w_h.shape
    num_outputs = w_out.shape[1]

    # Lane/sublane-friendly padded sizes.
    d_in_p = _round_up(d_in, 128)
    H_p = _round_up(H, 128)
    out_p = _round_up(num_outputs, 128)
    # Avoid gross batch over-padding at small B; keep sublane multiple of 8.
    TB = batch_tile if B >= batch_tile else _round_up(B, 8)
    B_p = _round_up(B, TB)
    n_steps = B_p // TB

    bf16, f32 = jnp.bfloat16, jnp.float32

    # Zero-pad; matmul operands -> bf16, biases stay f32.
    xp = jnp.zeros((B_p, d_in_p), bf16).at[:B, :d_in].set(x.astype(bf16))
    w_in_p = jnp.zeros((d_in_p, H_p), bf16).at[:d_in, :H].set(w_in.astype(bf16))
    b_in_p = jnp.zeros((1, H_p), f32).at[:, :H].set(b_in)
    w_h_p = jnp.zeros((L, H_p, H_p), bf16).at[:, :H, :H].set(w_h.astype(bf16))
    b_h_p = jnp.zeros((L, 1, H_p), f32).at[:, :, :H].set(b_h)
    w_out_p = (jnp.zeros((H_p, out_p), bf16)
               .at[:H, :num_outputs].set(w_out.astype(bf16)))
    b_out_p = jnp.zeros((1, out_p), f32).at[:, :num_outputs].set(b_out)

    # VMEM budget: resident weights/biases + double-buffered x/out tiles
    # + a few f32 activation slabs.
    # TODO(synk): if L * H_p * H_p (bf16) outgrows v7x's 64 MiB VMEM, stream
    #             w_h one layer at a time (grid axis over L or manual
    #             make_async_copy) instead of keeping the full stack resident.
    weight_bytes = ((w_in_p.size + w_h_p.size + w_out_p.size) * 2
                    + (b_in_p.size + b_h_p.size + b_out_p.size) * 4)
    act_bytes = 2 * (TB * d_in_p * 2 + TB * out_p * 4) + 3 * TB * H_p * 4
    vmem_limit = min(64 * 1024 * 1024,
                     max(8 * 1024 * 1024, 2 * (weight_bytes + act_bytes)))

    flops = 2 * B_p * (d_in_p * H_p + L * H_p * H_p + H_p * out_p)
    bytes_accessed = xp.size * 2 + weight_bytes + B_p * out_p * 4

    kernel = functools.partial(_gfn_mlp_kernel, num_layers=L)

    out_padded = pl.pallas_call(
        kernel,
        out_shape=jax.ShapeDtypeStruct((B_p, out_p), jnp.float32),
        grid=(n_steps,),
        in_specs=[
            pl.BlockSpec((TB, d_in_p), lambda i: (i, 0)),       # x   (per step)
            pl.BlockSpec((d_in_p, H_p), lambda i: (0, 0)),      # w_in (resident)
            pl.BlockSpec((1, H_p), lambda i: (0, 0)),           # b_in
            pl.BlockSpec((L, H_p, H_p), lambda i: (0, 0, 0)),   # w_h stack
            pl.BlockSpec((L, 1, H_p), lambda i: (0, 0, 0)),     # b_h stack
            pl.BlockSpec((H_p, out_p), lambda i: (0, 0)),       # w_out
            pl.BlockSpec((1, out_p), lambda i: (0, 0)),         # b_out
        ],
        out_specs=pl.BlockSpec((TB, out_p), lambda i: (i, 0)),
        compiler_params=pltpu.CompilerParams(
            dimension_semantics=("parallel",),
            vmem_limit_bytes=int(vmem_limit)),
        cost_estimate=pl.CostEstimate(
            flops=int(flops), transcendentals=0,
            bytes_accessed=int(bytes_accessed)),
    )(xp, w_in_p, b_in_p, w_h_p, b_h_p, w_out_p, b_out_p)

    return out_padded[:B, :num_outputs]


# --------------------------- Param construction -----------------------------


def init_params(key, num_tokens, num_outputs, num_hid, num_layers, max_len,
                partition_init=150.0):
    """Deterministic synthetic init matching the shapes of GFNMLP.__init__."""
    d_in = num_tokens * max_len
    keys = jax.random.split(key, 6)

    def lin(kw, kb, fan_in, fan_out):
        # PyTorch-style uniform(-1/sqrt(fan_in), 1/sqrt(fan_in)); stored as
        # [in, out] so the kernel computes x @ W.
        bound = 1.0 / jnp.sqrt(jnp.float32(fan_in))
        w = jax.random.uniform(kw, (fan_in, fan_out), jnp.float32,
                               -bound, bound)
        b = jax.random.uniform(kb, (1, fan_out), jnp.float32, -bound, bound)
        return w, b

    w_in, b_in = lin(keys[0], keys[1], d_in, num_hid)

    hk = jax.random.split(keys[2], 2 * num_layers)
    w_hs, b_hs = [], []
    for l in range(num_layers):
        w, b = lin(hk[2 * l], hk[2 * l + 1], num_hid, num_hid)
        w_hs.append(w)
        b_hs.append(b)
    w_h = jnp.stack(w_hs, axis=0)                     # [L, H, H]
    b_h = jnp.stack(b_hs, axis=0)                     # [L, 1, H]

    w_out, b_out = lin(keys[3], keys[4], num_hid, num_outputs)

    # _Z parameter (not used in forward, kept for shape completeness).
    z = jnp.ones((64,), jnp.float32) * (partition_init / 64.0)

    return {"w_in": w_in, "b_in": b_in, "w_h": w_h, "b_h": b_h,
            "w_out": w_out, "b_out": b_out, "_Z": z}


def reference_forward(x, params):
    """f32 reference with matmul inputs rounded to bf16 (matches the kernel's
    bf16-MXU / f32-accumulate numerics)."""
    r = lambda a: a.astype(jnp.bfloat16).astype(jnp.float32)
    dot = functools.partial(jnp.dot, precision=jax.lax.Precision.HIGHEST)
    h = dot(r(x), r(params["w_in"])) + params["b_in"]
    for l in range(params["w_h"].shape[0]):
        h = dot(r(jnp.maximum(h, 0.0)), r(params["w_h"][l])) + params["b_h"][l]
    return dot(r(h), r(params["w_out"])) + params["b_out"]


# --------------------------------- Main --------------------------------------


if __name__ == "__main__":
    # Small shapes consistent with the module's forward.
    num_tokens = 4
    max_len = 8          # -> input dim = 32
    num_hid = 32
    num_layers = 2
    num_outputs = 4
    batch = 16

    key = jax.random.PRNGKey(0)
    k_param, k_x = jax.random.split(key)

    params = init_params(k_param, num_tokens, num_outputs, num_hid,
                         num_layers, max_len)

    x = jax.random.normal(k_x, (batch, num_tokens * max_len), jnp.float32)
    # `mask` is ignored by GFNMLP.forward on the non-return_all path.

    # batch_tile=8 exercises a multi-step batch grid even at this tiny batch.
    out = gfn_mlp_forward(x, params, batch_tile=8)
    out = jax.block_until_ready(out)

    ref = reference_forward(x, params)
    assert out.shape == (batch, num_outputs)
    assert jnp.allclose(out, ref, atol=1e-3, rtol=1e-3), "mismatch vs reference"

    print("KERNEL_OK")
</pallas_src>

<mosaic_0001>
module attributes {stable_mosaic.version = 11 : i64} {
  func.func @_gfn_mlp_kernel(%arg0: i32, %arg1: memref<8x128xbf16, #tpu.memory_space<vmem>>, %arg2: memref<128x128xbf16, #tpu.memory_space<vmem>>, %arg3: memref<1x128xf32, #tpu.memory_space<vmem>>, %arg4: memref<2x128x128xbf16, #tpu.memory_space<vmem>>, %arg5: memref<2x1x128xf32, #tpu.memory_space<vmem>>, %arg6: memref<128x128xbf16, #tpu.memory_space<vmem>>, %arg7: memref<1x128xf32, #tpu.memory_space<vmem>>, %arg8: memref<8x128xf32, #tpu.memory_space<vmem>>) attributes {dimension_semantics = [#tpu.dimension_semantics<parallel>], iteration_bounds = array<i64: 2>, scalar_prefetch = 0 : i64, scratch_operands = 0 : i64, tpu.core_type = #tpu.core_type<tc>, window_params = [{transform_indices = @transform_0, window_bounds = array<i64: 8, 128>}, {pipeline_mode = #tpu.pipeline_mode<synchronous>, transform_indices = @transform_1, window_bounds = array<i64: 128, 128>}, {pipeline_mode = #tpu.pipeline_mode<synchronous>, transform_indices = @transform_2, window_bounds = array<i64: 1, 128>}, {pipeline_mode = #tpu.pipeline_mode<synchronous>, transform_indices = @transform_3, window_bounds = array<i64: 2, 128, 128>}, {pipeline_mode = #tpu.pipeline_mode<synchronous>, transform_indices = @transform_4, window_bounds = array<i64: 2, 1, 128>}, {pipeline_mode = #tpu.pipeline_mode<synchronous>, transform_indices = @transform_5, window_bounds = array<i64: 128, 128>}, {pipeline_mode = #tpu.pipeline_mode<synchronous>, transform_indices = @transform_6, window_bounds = array<i64: 1, 128>}, {transform_indices = @transform_7, window_bounds = array<i64: 8, 128>}]} {
    %c0 = arith.constant 0 : index
    %c0_0 = arith.constant 0 : index
    %0 = vector.load %arg1[%c0, %c0_0] : memref<8x128xbf16, #tpu.memory_space<vmem>>, vector<8x128xbf16>
    %c0_1 = arith.constant 0 : index
    %c0_2 = arith.constant 0 : index
    %1 = vector.load %arg2[%c0_1, %c0_2] : memref<128x128xbf16, #tpu.memory_space<vmem>>, vector<128x128xbf16>
    %cst = arith.constant dense<0.000000e+00> : vector<8x128xf32>
    %2 = tpu.matmul %0, %1, %cst {dimension_numbers = #tpu.dot_dimension_numbers<[1], [0], [0], [1], [0, 0, 1, 1], [], []>} : vector<8x128xbf16>, vector<128x128xbf16>, vector<8x128xf32> -> vector<8x128xf32>
    %c0_3 = arith.constant 0 : index
    %c0_4 = arith.constant 0 : index
    %3 = vector.load %arg3[%c0_3, %c0_4] : memref<1x128xf32, #tpu.memory_space<vmem>>, vector<1x128xf32>
    %4 = vector.broadcast %3 : vector<1x128xf32> to vector<8x128xf32>
    %5 = arith.addf %2, %4 : vector<8x128xf32>
    %cst_5 = arith.constant 0.000000e+00 : f32
    %6 = vector.broadcast %cst_5 : f32 to vector<8x128xf32>
    %7 = arith.maximumf %5, %6 : vector<8x128xf32>
    %8 = arith.truncf %7 : vector<8x128xf32> to vector<8x128xbf16>
    %c0_6 = arith.constant 0 : index
    %c0_7 = arith.constant 0 : index
    %c0_8 = arith.constant 0 : index
    %9 = vector.load %arg4[%c0_6, %c0_7, %c0_8] : memref<2x128x128xbf16, #tpu.memory_space<vmem>>, vector<1x128x128xbf16>
    %10 = vector.shape_cast %9 : vector<1x128x128xbf16> to vector<128x128xbf16>
    %cst_9 = arith.constant dense<0.000000e+00> : vector<8x128xf32>
    %11 = tpu.matmul %8, %10, %cst_9 {dimension_numbers = #tpu.dot_dimension_numbers<[1], [0], [0], [1], [0, 0, 1, 1], [], []>} : vector<8x128xbf16>, vector<128x128xbf16>, vector<8x128xf32> -> vector<8x128xf32>
    %c0_10 = arith.constant 0 : index
    %c0_11 = arith.constant 0 : index
    %c0_12 = arith.constant 0 : index
    %12 = vector.load %arg5[%c0_10, %c0_11, %c0_12] : memref<2x1x128xf32, #tpu.memory_space<vmem>>, vector<1x1x128xf32>
    %13 = vector.shape_cast %12 : vector<1x1x128xf32> to vector<1x128xf32>
    %14 = vector.broadcast %13 : vector<1x128xf32> to vector<8x128xf32>
    %15 = arith.addf %11, %14 : vector<8x128xf32>
    %cst_13 = arith.constant 0.000000e+00 : f32
    %16 = vector.broadcast %cst_13 : f32 to vector<8x128xf32>
    %17 = arith.maximumf %15, %16 : vector<8x128xf32>
    %18 = arith.truncf %17 : vector<8x128xf32> to vector<8x128xbf16>
    %c1 = arith.constant 1 : index
    %c0_14 = arith.constant 0 : index
    %c0_15 = arith.constant 0 : index
    %19 = vector.load %arg4[%c1, %c0_14, %c0_15] : memref<2x128x128xbf16, #tpu.memory_space<vmem>>, vector<1x128x128xbf16>
    %20 = vector.shape_cast %19 : vector<1x128x128xbf16> to vector<128x128xbf16>
    %cst_16 = arith.constant dense<0.000000e+00> : vector<8x128xf32>
    %21 = tpu.matmul %18, %20, %cst_16 {dimension_numbers = #tpu.dot_dimension_numbers<[1], [0], [0], [1], [0, 0, 1, 1], [], []>} : vector<8x128xbf16>, vector<128x128xbf16>, vector<8x128xf32> -> vector<8x128xf32>
    %c1_17 = arith.constant 1 : index
    %c0_18 = arith.constant 0 : index
    %c0_19 = arith.constant 0 : index
    %22 = vector.load %arg5[%c1_17, %c0_18, %c0_19] : memref<2x1x128xf32, #tpu.memory_space<vmem>>, vector<1x1x128xf32>
    %23 = vector.shape_cast %22 : vector<1x1x128xf32> to vector<1x128xf32>
    %24 = vector.broadcast %23 : vector<1x128xf32> to vector<8x128xf32>
    %25 = arith.addf %21, %24 : vector<8x128xf32>
    %26 = arith.truncf %25 : vector<8x128xf32> to vector<8x128xbf16>
    %c0_20 = arith.constant 0 : index
    %c0_21 = arith.constant 0 : index
    %27 = vector.load %arg6[%c0_20, %c0_21] : memref<128x128xbf16, #tpu.memory_space<vmem>>, vector<128x128xbf16>
    %cst_22 = arith.constant dense<0.000000e+00> : vector<8x128xf32>
    %28 = tpu.matmul %26, %27, %cst_22 {dimension_numbers = #tpu.dot_dimension_numbers<[1], [0], [0], [1], [0, 0, 1, 1], [], []>} : vector<8x128xbf16>, vector<128x128xbf16>, vector<8x128xf32> -> vector<8x128xf32>
    %c0_23 = arith.constant 0 : index
    %c0_24 = arith.constant 0 : index
    %29 = vector.load %arg7[%c0_23, %c0_24] : memref<1x128xf32, #tpu.memory_space<vmem>>, vector<1x128xf32>
    %30 = vector.broadcast %29 : vector<1x128xf32> to vector<8x128xf32>
    %31 = arith.addf %28, %30 : vector<8x128xf32>
    %c0_25 = arith.constant 0 : index
    %c0_26 = arith.constant 0 : index
    %32 = vector.load %arg8[%c0_25, %c0_26] : memref<8x128xf32, #tpu.memory_space<vmem>>, vector<8x128xf32>
    tpu.vector_store %arg8[%c0_25, %c0_26], %31 {strides = array<i32>} : memref<8x128xf32, #tpu.memory_space<vmem>>, vector<8x128xf32>,
    return
  }
  func.func @transform_0(%arg0: i32) -> (i32, i32) {
    %c0_i32 = arith.constant 0 : i32
    %c0_i32_0 = arith.constant 0 : i32
    return %arg0, %c0_i32 : i32, i32
  }
  func.func @transform_1(%arg0: i32) -> (i32, i32) {
    %c0_i32 = arith.constant 0 : i32
    %c0_i32_0 = arith.constant 0 : i32
    %c0_i32_1 = arith.constant 0 : i32
    return %c0_i32, %c0_i32_0 : i32, i32
  }
  func.func @transform_2(%arg0: i32) -> (i32, i32) {
    %c0_i32 = arith.constant 0 : i32
    %c0_i32_0 = arith.constant 0 : i32
    %c0_i32_1 = arith.constant 0 : i32
    return %c0_i32, %c0_i32_0 : i32, i32
  }
  func.func @transform_3(%arg0: i32) -> (i32, i32, i32) {
    %c0_i32 = arith.constant 0 : i32
    %c0_i32_0 = arith.constant 0 : i32
    %c0_i32_1 = arith.constant 0 : i32
    %c0_i32_2 = arith.constant 0 : i32
    return %c0_i32, %c0_i32_0, %c0_i32_1 : i32, i32, i32
  }
  func.func @transform_4(%arg0: i32) -> (i32, i32, i32) {
    %c0_i32 = arith.constant 0 : i32
    %c0_i32_0 = arith.constant 0 : i32
    %c0_i32_1 = arith.constant 0 : i32
    %c0_i32_2 = arith.constant 0 : i32
    return %c0_i32, %c0_i32_0, %c0_i32_1 : i32, i32, i32
  }
  func.func @transform_5(%arg0: i32) -> (i32, i32) {
    %c0_i32 = arith.constant 0 : i32
    %c0_i32_0 = arith.constant 0 : i32
    %c0_i32_1 = arith.constant 0 : i32
    return %c0_i32, %c0_i32_0 : i32, i32
  }
  func.func @transform_6(%arg0: i32) -> (i32, i32) {
    %c0_i32 = arith.constant 0 : i32
    %c0_i32_0 = arith.constant 0 : i32
    %c0_i32_1 = arith.constant 0 : i32
    return %c0_i32, %c0_i32_0 : i32, i32
  }
  func.func @transform_7(%arg0: i32) -> (i32, i32) {
    %c0_i32 = arith.constant 0 : i32
    %c0_i32_0 = arith.constant 0 : i32
    return %arg0, %c0_i32 : i32, i32
  }
}

</mosaic_0001>

<bundles_post_ra>
// kernel: tpu_custom_call.1
= control target key start
LH: loop header
LB: loop body
LE: loop exit
PB: predicated region body
PF: predicated region fallthrough
CT: control target
= control target key end

     0   :  { %12 = vsyncpa [#allocation3], 0  ;;  %s1747_s0 = inlined_call_operand.hbm [shape: bf16[16,128], index: 0, kind: input, shape index: {}]   ;;  %s1748_s1 = inlined_call_operand.hbm [shape: bf16[128,128], index: 1, kind: input, shape index: {}]   ;;  %s1749_s2 = inlined_call_operand.vmem [shape: f32[1,128], index: 2, kind: input, shape index: {}]   ;;  %s1750_s3 = inlined_call_operand.hbm [shape: bf16[2,128,128], index: 3, kind: input, shape index: {}]   ;;  %s1751_s4 = inlined_call_operand.vmem [shape: f32[2,1,128], index: 4, kind: input, shape index: {}]   ;;  %s1752_s5 = inlined_call_operand.hbm [shape: bf16[128,128], index: 5, kind: input, shape index: {}]   ;;  %s1753_s6 = inlined_call_operand.vmem [shape: f32[1,128], index: 6, kind: input, shape index: {}]   ;;  %s1754_s7 = inlined_call_operand.hbm [shape: f32[16,128], index: 7, kind: output, shape index: {}]  }
   0x1   :  { %14 = vsyncpa [#allocation3 + $0x1], 0 }
   0x2   :  { %15 = vsyncpa [#allocation6], 0 }
   0x3   :  { %16 = vsyncpa [#allocation9], 0 }
   0x4   :  { %17 = vsyncpa [#allocation4], 0 }
   0x5   :  { %19 = vsyncpa [#allocation4 + $0x1], 0  ;;  %s1428_s24 = smov 0   ;;  %s1430_s25 = smov 0  }
   0x6   :  { %s1432_s26 = smov 0   ;;  %s1434_s27 = smov 0  }
   0x7 LB: > { %s1449_s28 = sadd.s32 4294967295, %s1377_s27   ;;  %s905_s29 = sadd.s32 4294967294, %s1377_s27   ;;  %s1377_s27 = sphi %s1434_s27, %s1780_s27   ;;  %s1373_s26 = sphi %s1432_s26, %s1779_s26   ;;  %s1369_s25 = sphi %s1430_s25, %s1778_s25   ;;  %s1365_s24 = sphi %s1428_s24, %s1777_s24  }
   0x8   : > { %p45_p0 = scmp.ne.s32.totalorder %s1369_s25, %s1365_s24  ;;  %p1755_p1 = scmp.eq.s32.totalorder %s1449_s28, 0 }
   0x9   : > { %p201_p3 = scmp.eq.s32.totalorder %s905_s29, 1  ;;  %p906_p5 = scmp.ge.s32.totalorder %s1377_s27, 1 }
   0xa   : > { %p1458_p4 = por %p1755_p1, %p45_p0  ;;  %p208_p7 = scmp.lt.s32.totalorder %s1377_s27, 3 }
   0xb   : > { %p1463_p6 = por %p201_p3, %p45_p0  ;;  %s1379_s10 = smov [#allocation5]  }
   0xc   : > { %s1759_s30 = scalar_select %p1458_p4, 1, 0 }
   0xd   : > { %s1760_s8 = scalar_select %p1463_p6, 1, 0 }
   0xe   : > { %p1468_p8 = pnand %p906_p5, %p208_p7  ;;  %s220_s11 = sshll.u32 %s1379_s10, 4  ;;  %s1472_s11 = int_to_ptr.vmem [resolvable:$true] %s220_s11 }
   0xf   : > { %1761 = sst [smem:[#allocation15_spill]] %s1760_s8  ;;  %s1380_s13 = smov [#allocation7]  }
  0x10   : > { %s1762_s9 = scalar_select %p1468_p8, 1, 0 }
  0x11   : > { %p1092_p9 = pneg %p1468_p8  ;;  %s236_s14 = sshll.u32 %s1380_s13, 4  ;;  %s1483_s14 = int_to_ptr.vmem [resolvable:$true] %s236_s14 }
  0x12   : > { %s1381_s15 = smov [#allocation8]   ;;  %s1189_s19 = scalar_lea.hbm %s1748_s1, 1024 }
  0x13   : > { %p1479_p11 = pnand %p1092_p9, %p1755_p1  ;;  %s1485_s16 = sshll.u32 %s1381_s15, 4  ;;  %s253_s16 = int_to_ptr.vmem [resolvable:$true] %s1485_s16 }
  0x14   : > { %p1190_p12 = scmp.ne.s32.totalorder %s1748_s1, %s1189_s19  ;;  %p1196_p5 = scmp.lt.u32.totalorder %s1189_s19, %s1748_s1 }
  0x15   : > { %p1495_p13 = pneg %p1479_p11 }
  0x17   : > { %p1192_p0 = pnand %p1495_p13, %p1190_p12 }
  0x19   : > { %p1193_p3 = pneg %p1192_p0 }
  0x1b   : > { %p1198_p7 = pnand %p1196_p5, %p1193_p3 }
  0x1d   : > { %1201 = shalt.err (!%p1198_p7)
}
  0x1e   : > { %s1202_s10 = scalar_lea.vmem %s1472_s11, 1024  ;;  %p1210_p2 = scmp.lt.s32.totalorder %s1472_s11, %s1472_s11 }
  0x1f   : > { %p1203_p9 = scmp.ne.s32.totalorder %s1472_s11, %s1202_s10  ;;  %p1211_p6 = scmp.lt.s32.totalorder %s1202_s10, %s1202_s10 }
  0x21   : > { %p1205_p10 = pnand %p1203_p9, %p1495_p13  ;;  %p1212_p12 = por %p1211_p6, %p1210_p2 }
  0x23   : > { %p1206_p1 = pneg %p1205_p10 }
  0x25   : > { %p1213_p0 = pnand %p1212_p12, %p1206_p1 }
  0x27   : > { %1216 = shalt.err (!%p1213_p0)
}
  0x28   : > { %s1382_s13 = smov 64   ;;  %s1383_s15 = smov 4  }
  0x29   : > { %1095 = dma.hbm_to_vmem [thread:$0]  (!%p1479_p11), %s1748_s1, 1024, %s1472_s11, [#allocation6], %s1382_s13, %s1382_s13, %s1383_s15  }
  0x2a   : > { %s1217_s21 = scalar_lea.hbm %s1750_s3, 2048 }
  0x2b   : > { %p1218_p1 = scmp.ne.s32.totalorder %s1750_s3, %s1217_s21  ;;  %p1224_p10 = scmp.lt.u32.totalorder %s1217_s21, %s1750_s3 }
  0x2d   : > { %p1220_p2 = pnand %p1218_p1, %p1495_p13 }
  0x2f   : > { %p1221_p6 = pneg %p1220_p2 }
  0x31   : > { %p1226_p3 = pnand %p1224_p10, %p1221_p6 }
  0x33   : > { %1229 = shalt.err (!%p1226_p3)
}
  0x34   : > { %s1230_s11 = scalar_lea.vmem %s1483_s14, 2048  ;;  %p1238_p12 = scmp.lt.s32.totalorder %s1483_s14, %s1483_s14 }
  0x35   : > { %p1231_p5 = scmp.ne.s32.totalorder %s1483_s14, %s1230_s11  ;;  %p1239_p0 = scmp.lt.s32.totalorder %s1230_s11, %s1230_s11 }
  0x37   : > { %p1233_p7 = pnand %p1231_p5, %p1495_p13  ;;  %p1240_p1 = por %p1239_p0, %p1238_p12 }
  0x39   : > { %p1234_p9 = pneg %p1233_p7 }
  0x3b   : > { %p1241_p2 = pnand %p1240_p1, %p1234_p9 }
  0x3d   : > { %1244 = shalt.err (!%p1241_p2)
}
  0x3e   : > { %1098 = dma.hbm_to_vmem [thread:$0]  (!%p1479_p11), %s1750_s3, 2048, %s1483_s14, [#allocation6], %s1382_s13, %s1382_s13, %s1383_s15  }
  0x3f   : > { %s1245_s20 = scalar_lea.hbm %s1752_s5, 1024 }
  0x40   : > { %p1246_p6 = scmp.ne.s32.totalorder %s1752_s5, %s1245_s20  ;;  %p1252_p5 = scmp.lt.u32.totalorder %s1245_s20, %s1752_s5 }
  0x42   : > { %p1248_p10 = pnand %p1246_p6, %p1495_p13 }
  0x44   : > { %p1249_p3 = pneg %p1248_p10 }
  0x46   : > { %p1254_p7 = pnand %p1252_p5, %p1249_p3 }
  0x48   : > { %1257 = shalt.err (!%p1254_p7)
}
  0x49   : > { %s1258_s11 = scalar_lea.vmem %s253_s16, 1024  ;;  %p1266_p1 = scmp.lt.s32.totalorder %s253_s16, %s253_s16 }
  0x4a   : > { %p1259_p9 = scmp.ne.s32.totalorder %s253_s16, %s1258_s11  ;;  %p1267_p2 = scmp.lt.s32.totalorder %s1258_s11, %s1258_s11 }
  0x4c   : > { %p1261_p12 = pnand %p1259_p9, %p1495_p13  ;;  %p1268_p4 = por %p1267_p2, %p1266_p1 }
  0x4e   : > { %p1262_p0 = pneg %p1261_p12 }
  0x50   : > { %p1269_p8 = pnand %p1268_p4, %p1262_p0 }
  0x52   : > { %1272 = shalt.err (!%p1269_p8)
}
  0x53   : > { %1101 = dma.hbm_to_vmem [thread:$0]  (!%p1479_p11), %s1752_s5, 1024, %s253_s16, [#allocation9], %s1382_s13, %s1382_s13, %s1383_s15  }
  0x54   : > { %s1568_s22 = sadd.s32 1, %s1377_s27   ;;  %s32_s17 = sadd.s32 1, %s1373_s26 }
  0x55   : > { %s29_s12 = ssub.s32 %s1377_s27, %s1568_s22  ;;  %p39_p8 = scmp.ne.s32.totalorder %s1373_s26, %s1369_s25 }
  0x56   : > { %p30_p4 = scmp.eq.s32.totalorder %s29_s12, 0  ;;  %p40_p13 = scmp.eq.s32.totalorder %s1377_s27, 0 }
  0x57   : > { %p1113_p6 = scmp.lt.s32.totalorder %s1377_s27, 2  ;;  %p1765_p3 = scmp.eq.s32.totalorder %s1449_s28, 1 }
  0x58   : > { %s1578_s18 = scalar_select %p30_p4, %s1373_s26, %s32_s17  }
  0x59   : > { %p41_p10 = por %p40_p13, %p39_p8  ;;  %p1582_p5 = por %p1765_p3, %p39_p8 }
  0x5a   : > { %s269_s20 = sand.u32 1, %s1373_s26   ;;  %s912_s21 = sshll.u32 %s1377_s27, 6 }
  0x5b   : > { %s911_s16 = sshll.u32 %s269_s20, 2  ;;  %s1591_s23 = scalar_lea.hbm %s1747_s0, %s912_s21 }
  0x5c   : > { %s273_s29 = scalar_lea.vmem [#allocation2], %s911_s16  ;;  %p1593_p11 = pnand %p1113_p6, %p41_p10 }
  0x5d   : > { %s280_s10 = sshll.u32 %s273_s29, 4  ;;  %s270_s14 = scalar_lea.sflag [#allocation3], %s269_s20  ;;  %s1597_s10 = int_to_ptr.vmem [resolvable:$true] %s280_s10 }
  0x5e   : > { %s1273_s8 = scalar_lea.hbm %s1591_s23, 64  ;;  %p1275_p9 = pneg %p1593_p11 }
  0x5f   : > { %p1274_p7 = scmp.ne.s32.totalorder %s1591_s23, %s1273_s8  ;;  %s1278_s21 = scalar_lea.hbm %s1747_s0, 128 }
  0x60   : > { %p1279_p1 = scmp.lt.u32.totalorder %s1591_s23, %s1747_s0  ;;  %p1280_p2 = scmp.lt.u32.totalorder %s1278_s21, %s1273_s8 }
  0x61   : > { %p1276_p12 = pnand %p1275_p9, %p1274_p7  ;;  %p1282_p8 = scmp.lt.u32.totalorder %s1273_s8, %s1591_s23 }
  0x62   : > { %p1281_p4 = por %p1280_p2, %p1279_p1 }
  0x63   : > { %p1277_p0 = pneg %p1276_p12 }
  0x64   : > { %p1283_p13 = por %p1282_p8, %p1281_p4 }
  0x66   : > { %p1284_p6 = pnand %p1283_p13, %p1277_p0 }
  0x68   : > { %1287 = shalt.err (!%p1284_p6)
}
  0x69   : > { %s1288_s20 = scalar_lea.vmem %s1597_s10, 64  ;;  %s1384_s15 = smov [#allocation2]  }
  0x6a   : > { %p1289_p10 = scmp.ne.s32.totalorder %s1597_s10, %s1288_s20  ;;  %s1293_s29 = sshll.u32 %s1384_s15, 4  ;;  %s1294_s29 = int_to_ptr.vmem [resolvable:$false] %s1293_s29 }
  0x6b   : > { %s1295_s12 = scalar_lea.vmem %s1294_s29, 128  ;;  %p1296_p12 = scmp.lt.s32.totalorder %s1597_s10, %s1294_s29 }
  0x6c   : > { %p1291_p3 = pnand %p1289_p10, %p1275_p9  ;;  %p1297_p1 = scmp.lt.s32.totalorder %s1295_s12, %s1288_s20 }
  0x6e   : > { %p1292_p7 = pneg %p1291_p3  ;;  %p1298_p2 = por %p1297_p1, %p1296_p12 }
  0x70   : > { %p1299_p4 = pnand %p1298_p2, %p1292_p7 }
  0x72   : > { %1302 = shalt.err (!%p1299_p4)
}
  0x73   : > { %1105 = dma.hbm_to_vmem [thread:$0]  (!%p1593_p11), %s1591_s23, 64, %s1597_s10, %s270_s14  }
  0x74   : > { %p1768_p0 = scmp.ne.s32.totalorder %s1762_s9, 0 }
  0x75   : > { %s1627_s8 = sand.u32 (!%p1768_p0), 1, %s1369_s25   ;;  %p1769_p9 = scmp.ne.s32.totalorder (!%p1768_p0), %s1759_s30, 0 }
  0x76   : > { %289 = sbr.rel (%p1768_p0) target bundleno = 1047 (0x417), region = 48  ;;  %s914_s17 = sshll.u32 (!%p1768_p0), %s1627_s8, 2 }
  0x77   : > { %s292_s21 = scalar_lea.sflag (!%p1768_p0), [#allocation3], %s1627_s8  ;;  %s1631_s16 = scalar_lea.vmem (!%p1768_p0), [#allocation2], %s914_s17 }
  0x7d   : > { %1348 = dma.done.wait (%p1769_p9), %s292_s21, 64  }
  0x7e   : > { %1350 = vsyncadd (%p1769_p9), %s292_s21, 4294967232  ;;  %p1770_p11 = scmp.eq.s32.totalorder %s1449_s28, 0 }
  0x80   : > { %1352 = dma.done.wait (%p1770_p11), [#allocation6], 3072   ;;  %p1771_p8 = pmov %p1770_p11 }
  0x82   : > { %1354 = vsyncadd (%p1771_p8), [#allocation6], 4294964224  ;;  %p1772_p13 = pmov %p1771_p8 }
  0x83   : > { %p1773_p6 = pmov %p1771_p8 }
  0x84   : > { %1356 = dma.done.wait (%p1772_p13), [#allocation9], 1024  }
  0x85   : > { %1358 = vsyncadd (%p1773_p6), [#allocation9], 4294966272  ;;  %v1385_v0 = vmov 0.0   ;;  %vm1386_vm0 = vmmov 0   ;;  %v1157_v1 = vld [vmem:[#allocation5] sm:$0xff]   ;;  %v1158_v2 = vld [vmem:[#allocation5 + $0x8] sm:$0xff]  }
  0x86   : > { %996 = vmatprep.subr.bf16.mxu0 %v1385_v0  ;;  %1012 = vmatprep.mubr.msk.bf16.mxu0 %vm1386_vm0, %v1385_v0  ;;  %v1159_v3 = vld [vmem:[#allocation5 + $0x10] sm:$0xff]   ;;  %v1165_v4 = vld [vmem:[#allocation7] sm:$0xff]   ;;  %v1160_v5 = vld [vmem:[#allocation5 + $0x18] sm:$0xff]   ;;  %s918_s13 = sshll.u32 %s1627_s8, 3  ;;  %s957_s29 = sshll.u32 %s1449_s28, 7 }
  0x87   : > { %1016 = vmatprep.subr.bf16.mxu1 %v1385_v0  ;;  %1032 = vmatprep.mubr.msk.bf16.mxu1 %vm1386_vm0, %v1385_v0  ;;  %v1166_v6 = vld [vmem:[#allocation7 + $0x8] sm:$0xff]   ;;  %v1161_v7 = vld [vmem:[#allocation5 + $0x20] sm:$0xff]   ;;  %v1167_v8 = vld [vmem:[#allocation7 + $0x10] sm:$0xff]   ;;  %s337_s12 = scalar_lea.vmem [#allocation10], %s918_s13  ;;  %s1703_s30 = scalar_lea.hbm %s1754_s7, %s957_s29 }
  0x88   : > { %997 = vmatpush3.bf16.msra.mxu0 %v1157_v1  ;;  %1017 = vmatpush3.bf16.msra.mxu1 %v1165_v4  ;;  %v1162_v9 = vld [vmem:[#allocation5 + $0x28] sm:$0xff]   ;;  %v1168_v10 = vld [vmem:[#allocation7 + $0x18] sm:$0xff]   ;;  %v1163_v11 = vld [vmem:[#allocation5 + $0x30] sm:$0xff]   ;;  %s806_s17 = sshll.u32 %s337_s12, 4  ;;  %s793_s9 = scalar_lea.sflag [#allocation4], %s1627_s8  ;;  %s1705_s17 = int_to_ptr.vmem [resolvable:$true] %s806_s17 }
  0x89   : > { %998 = vmatprep.subr.bf16.mxu0 %v1385_v0  ;;  %1018 = vmatprep.subr.bf16.mxu1 %v1385_v0  ;;  %v1169_v12 = vld [vmem:[#allocation7 + $0x20] sm:$0xff]   ;;  %v1164_v13 = vld [vmem:[#allocation5 + $0x38] sm:$0xff]   ;;  %v1170_v14 = vld [vmem:[#allocation7 + $0x28] sm:$0xff]   ;;  %s1303_s28 = scalar_lea.vmem %s1705_s17, 128  ;;  %s1387_s23 = smov [#allocation10]  }
  0x8a   : > { %v339_v15 = vld [vmem:[%s1631_s16] sm:$0xf]  ;;  %v1171_v16 = vld [vmem:[#allocation7 + $0x30] sm:$0xff]   ;;  %v1173_v18 = vld [vmem:[#allocation7 + $0x40] sm:$0xff]   ;;  %p1304_p10 = scmp.ne.s32.totalorder %s1705_s17, %s1303_s28  ;;  %s1307_s10 = sshll.u32 %s1387_s23, 4  ;;  %s1308_s10 = int_to_ptr.vmem [resolvable:$false] %s1307_s10 }
  0x8b   : > { %v1172_v17 = vld [vmem:[#allocation7 + $0x38] sm:$0xff]   ;;  %v1174_v19 = vld [vmem:[#allocation7 + $0x48] sm:$0xff]   ;;  %v1175_v20 = vld [vmem:[#allocation7 + $0x50] sm:$0xff]   ;;  %s1309_s11 = scalar_lea.vmem %s1308_s10, 256  ;;  %p1310_p12 = scmp.lt.s32.totalorder %s1705_s17, %s1308_s10 }
  0x8c   : > { %999 = vmatpush3.bf16.msra.mxu0 %v1158_v2  ;;  %1019 = vmatpush3.bf16.msra.mxu1 %v1166_v6  ;;  %v1176_v21 = vld [vmem:[#allocation7 + $0x58] sm:$0xff]   ;;  %v1177_v22 = vld [vmem:[#allocation7 + $0x60] sm:$0xff]   ;;  %v1178_v23 = vld [vmem:[#allocation7 + $0x68] sm:$0xff]   ;;  %p1305_p3 = pnand %p1304_p10, %p1582_p5  ;;  %p1311_p1 = scmp.lt.s32.totalorder %s1309_s11, %s1303_s28 }
  0x8d   : > { %1000 = vmatprep.subr.bf16.mxu0 %v1385_v0  ;;  %1020 = vmatprep.subr.bf16.mxu1 %v1385_v0  ;;  %v919_v24 = vld [vmem:[%s1749_s2] ss:$0 sm:$0xff]  ;;  %v1179_v32 = vld [vmem:[#allocation7 + $0x70] sm:$0xff]   ;;  %v1181_v34 = vld [vmem:[#allocation8] sm:$0xff]  }
  0x8e   : > { %v1180_v33 = vld [vmem:[#allocation7 + $0x78] sm:$0xff]   ;;  %v1182_v35 = vld [vmem:[#allocation8 + $0x8] sm:$0xff]   ;;  %v1183_v36 = vld [vmem:[#allocation8 + $0x10] sm:$0xff]   ;;  %p1306_p7 = pneg %p1305_p3  ;;  %p1312_p2 = por %p1311_p1, %p1310_p12 }
  0x8f   : > { %v1184_v37 = vld [vmem:[#allocation8 + $0x18] sm:$0xff]   ;;  %v1185_v38 = vld [vmem:[#allocation8 + $0x20] sm:$0xff]   ;;  %v1186_v39 = vld [vmem:[#allocation8 + $0x28] sm:$0xff]  }
  0x90   : > { %1001 = vmatpush3.bf16.msra.mxu0 %v1159_v3  ;;  %1021 = vmatpush3.bf16.msra.mxu1 %v1167_v8  ;;  %v1187_v40 = vld [vmem:[#allocation8 + $0x30] sm:$0xff]   ;;  %v928_v41 = vld [vmem:[%s1751_s4] ss:$0 sm:$0xff]  ;;  %v938_v50 = vld [vmem:[%s1751_s4 + $0x1] ss:$0 sm:$0xff]  ;;  %p1313_p4 = pnand %p1312_p2, %p1306_p7 }
  0x91   : > { %1002 = vmatprep.subr.bf16.mxu0 %v1385_v0  ;;  %1022 = vmatprep.subr.bf16.mxu1 %v1385_v0  ;;  %v1188_v49 = vld [vmem:[#allocation8 + $0x38] sm:$0xff]  }
  0x92   : > { %v947_v57 = vld [vmem:[%s1753_s6] ss:$0 sm:$0xff] }
  0x94   : > { %1003 = vmatpush3.bf16.msra.mxu0 %v1160_v5  ;;  %1023 = vmatpush3.bf16.msra.mxu1 %v1168_v10 }
  0x95   : > { %1004 = vmatprep.subr.bf16.mxu0 %v1385_v0  ;;  %1024 = vmatprep.subr.bf16.mxu1 %v1385_v0 }
  0x98   : > { %1005 = vmatpush3.bf16.msra.mxu0 %v1161_v7  ;;  %1025 = vmatpush3.bf16.msra.mxu1 %v1169_v12 }
  0x99   : > { %1006 = vmatprep.subr.bf16.mxu0 %v1385_v0  ;;  %1026 = vmatprep.subr.bf16.mxu1 %v1385_v0 }
  0x9c   : > { %1007 = vmatpush3.bf16.msra.mxu0 %v1162_v9  ;;  %1027 = vmatpush3.bf16.msra.mxu1 %v1170_v14 }
  0x9d   : > { %1008 = vmatprep.subr.bf16.mxu0 %v1385_v0  ;;  %1028 = vmatprep.subr.bf16.mxu1 %v1385_v0 }
  0xa0   : > { %1009 = vmatpush3.bf16.msra.mxu0 %v1163_v11  ;;  %1029 = vmatpush3.bf16.msra.mxu1 %v1171_v16 }
  0xa1   : > { %1010 = vmatprep.subr.bf16.mxu0 %v1385_v0  ;;  %1030 = vmatprep.subr.bf16.mxu1 %v1385_v0 }
  0xa4   : > { %1011 = vmatpush3.bf16.msra.mxu0 %v1164_v13  ;;  %1031 = vmatpush3.bf16.msra.mxu1 %v1172_v17 }
  0xa5   : > { %1036 = vmatprep.subr.bf16.mxu0 %v1385_v0  ;;  %1056 = vmatprep.subr.bf16.mxu1 %v1385_v0 }
  0xa7   : > { %1013 = vmatmul.mubr.bf16.vlgmr.msra.gmra.mrb[0].mxu0 %v339_v15 }
  0xa8   : > { %1052 = vmatprep.mubr.msk.bf16.mxu0 %vm1386_vm0, %v1385_v0  ;;  %1037 = vmatpush3.bf16.msra.mxu0 %v1173_v18 }
  0xa9   : > { %1038 = vmatprep.subr.bf16.mxu0 %v1385_v0 }
  0xac   : > { %1039 = vmatpush3.bf16.msra.mxu0 %v1174_v19 }
  0xad   : > { %1040 = vmatprep.subr.bf16.mxu0 %v1385_v0 }
  0xb0   : > { %1041 = vmatpush3.bf16.msra.mxu0 %v1175_v20 }
  0xb1   : > { %1042 = vmatprep.subr.bf16.mxu0 %v1385_v0 }
  0xb4   : > { %1043 = vmatpush3.bf16.msra.mxu0 %v1176_v21 }
  0xb5   : > { %1044 = vmatprep.subr.bf16.mxu0 %v1385_v0 }
  0xb8   : > { %1045 = vmatpush3.bf16.msra.mxu0 %v1177_v22 }
  0xb9   : > { %1046 = vmatprep.subr.bf16.mxu0 %v1385_v0 }
  0xbc   : > { %1047 = vmatpush3.bf16.msra.mxu0 %v1178_v23 }
  0xbd   : > { %1048 = vmatprep.subr.bf16.mxu0 %v1385_v0 }
  0xc0   : > { %1049 = vmatpush3.bf16.msra.mxu0 %v1179_v32 }
  0xc1   : > { %1050 = vmatprep.subr.bf16.mxu0 %v1385_v0 }
  0xc4   : > { %1051 = vmatpush3.bf16.msra.mxu0 %v1180_v33 }
 0x17a   : > { %v445_v25 = vpop.f32.mrb[0].mxu0 }
 0x17b   : > { %v446_v26 = vadd.f32 %v919_v24, %v445_v25  ;;  %v1014_v27 = vpop.f32.mrb[1].mxu0 }
 0x17c   : > { %v448_v28 = vpop.f32.mrb[2].mxu0 }
 0x17d   : > { %v451_v29 = vmax.f32 %v446_v26, 0.0  ;;  %v1015_v30 = vpop.f32.mrb[3].mxu0 }
 0x17f   : > { %v452_v31 = vpack.c.bf16 %v451_v29, %v451_v29 }
 0x181   : > { %1033 = vmatmul.mubr.bf16.vlgmr.msra.gmra.mrb[0].mxu1 %v452_v31 }
 0x182   : > { %1072 = vmatprep.mubr.msk.bf16.mxu1 %vm1386_vm0, %v1385_v0  ;;  %1057 = vmatpush3.bf16.msra.mxu1 %v1181_v34 }
 0x183   : > { %1058 = vmatprep.subr.bf16.mxu1 %v1385_v0 }
 0x186   : > { %1059 = vmatpush3.bf16.msra.mxu1 %v1182_v35 }
 0x187   : > { %1060 = vmatprep.subr.bf16.mxu1 %v1385_v0 }
 0x18a   : > { %1061 = vmatpush3.bf16.msra.mxu1 %v1183_v36 }
 0x18b   : > { %1062 = vmatprep.subr.bf16.mxu1 %v1385_v0 }
 0x18e   : > { %1063 = vmatpush3.bf16.msra.mxu1 %v1184_v37 }
 0x18f   : > { %1064 = vmatprep.subr.bf16.mxu1 %v1385_v0 }
 0x192   : > { %1065 = vmatpush3.bf16.msra.mxu1 %v1185_v38 }
 0x193   : > { %1066 = vmatprep.subr.bf16.mxu1 %v1385_v0 }
 0x196   : > { %1067 = vmatpush3.bf16.msra.mxu1 %v1186_v39 }
 0x197   : > { %1068 = vmatprep.subr.bf16.mxu1 %v1385_v0 }
 0x19a   : > { %1069 = vmatpush3.bf16.msra.mxu1 %v1187_v40 }
 0x19b   : > { %1070 = vmatprep.subr.bf16.mxu1 %v1385_v0 }
 0x19e   : > { %1071 = vmatpush3.bf16.msra.mxu1 %v1188_v49 }
 0x254   : > { %v558_v42 = vpop.f32.mrb[0].mxu1 }
 0x255   : > { %v559_v43 = vadd.f32 %v928_v41, %v558_v42  ;;  %v1034_v44 = vpop.f32.mrb[1].mxu1 }
 0x256   : > { %v561_v45 = vpop.f32.mrb[2].mxu1 }
 0x257   : > { %v564_v46 = vmax.f32 %v559_v43, 0.0  ;;  %v1035_v47 = vpop.f32.mrb[3].mxu1 }
 0x259   : > { %v565_v48 = vpack.c.bf16 %v564_v46, %v564_v46 }
 0x25b   : > { %1053 = vmatmul.mubr.bf16.vlgmr.msra.gmra.mrb[4].mxu0 %v565_v48 }
 0x32e   : > { %v673_v51 = vpop.f32.mrb[4].mxu0 }
 0x32f   : > { %v674_v52 = vadd.f32 %v938_v50, %v673_v51  ;;  %v1054_v53 = vpop.f32.mrb[5].mxu0 }
 0x330   : > { %v676_v54 = vpop.f32.mrb[6].mxu0 }
 0x331   : > { %v679_v55 = vpack.c.bf16 %v674_v52, %v674_v52  ;;  %v1055_v56 = vpop.f32.mrb[7].mxu0 }
 0x333   : > { %1073 = vmatmul.mubr.bf16.vlgmr.msra.gmra.mrb[4].mxu1 %v679_v55 }
 0x406   : > { %v785_v58 = vpop.f32.mrb[4].mxu1 }
 0x407   : > { %v786_v59 = vadd.f32 %v947_v57, %v785_v58  ;;  %v1074_v60 = vpop.f32.mrb[5].mxu1 }
 0x408   : > { %v788_v61 = vpop.f32.mrb[6].mxu1 }
 0x409   : > { %791 = vst [vmem:[%s337_s12] sm:$0xff] %v786_v59  ;;  %v1075_v62 = vpop.f32.mrb[7].mxu1 }
 0x40a   : > { %1316 = shalt.err (!%p1313_p4)
}
 0x40b   : > { %s1317_s8 = scalar_lea.hbm %s1703_s30, 128  ;;  %s1321_s20 = scalar_lea.hbm %s1754_s7, 256 }
 0x40c   : > { %p1318_p0 = scmp.ne.s32.totalorder %s1703_s30, %s1317_s8  ;;  %p1322_p8 = scmp.lt.u32.totalorder %s1703_s30, %s1754_s7 }
 0x40d   : > { %p1323_p13 = scmp.lt.u32.totalorder %s1321_s20, %s1317_s8  ;;  %p1325_p10 = scmp.lt.u32.totalorder %s1317_s8, %s1703_s30 }
 0x40e   : > { %p1319_p9 = pnand %p1318_p0, %p1582_p5 }
 0x40f   : > { %p1324_p6 = por %p1323_p13, %p1322_p8 }
 0x410   : > { %p1320_p11 = pneg %p1319_p9 }
 0x411   : > { %p1326_p3 = por %p1325_p10, %p1324_p6 }
 0x413   : > { %p1327_p7 = pnand %p1326_p3, %p1320_p11 }
 0x415   : > { %1330 = shalt.err (!%p1327_p7)
}
 0x416   : > { %1090 = dma.vmem_to_hbm [thread:$0]  (%p1582_p5), %s1705_s17, 128, %s1703_s30, %s793_s9  }
 0x417 PF: > { %s1774_s12 = sld [smem:[#allocation15_spill]]  ;;  %s818_s21 = sand.u32 1, %s1365_s24  }
 0x418   : > { %p1776_p1 = scmp.ge.s32.totalorder %s1377_s27, 2  ;;  %s819_s16 = scalar_lea.sflag [#allocation4], %s818_s21 }
 0x41d   : > { %p1775_p12 = scmp.ne.s32.totalorder %s1774_s12, 0 }
 0x41f   : > { %p1107_p2 = pnand %p1776_p1, %p1775_p12 }
 0x421   : > { %1360 = dma.done.wait (!%p1107_p2), %s819_s16, 128  }
 0x422   : > { %1362 = vsyncadd (!%p1107_p2), %s819_s16, 4294967168  ;;  %p22_p4 = scmp.ge.s32.totalorder %s1568_s22, 4   ;;  %s1777_s24 = smov %s1369_s25 }
 0x423   : > { %s1778_s25 = smov %s1373_s26  ;;  %s1779_s26 = smov %s1578_s18 }
 0x424   : > { %s1780_s27 = smov %s1568_s22  ;;  %24 = sbr.rel (!%p22_p4) target bundleno = 7 (0x7), region = 107 }
 0x42b   :  { %824 = vsyncpa [#allocation3], 1 }
 0x42c   :  { %826 = vsyncpa [#allocation3 + $0x1], 1 }
 0x42d   :  { %827 = vsyncpa [#allocation6], 1 }
 0x42e   :  { %828 = vsyncpa [#allocation9], 1 }
 0x42f   :  { %829 = vsyncpa [#allocation4], 1 }
 0x430   :  { %831 = vsyncpa [#allocation4 + $0x1], 1 }

</bundles_post_ra>
